<compile_context>
chip_gen: v7x
topology: tpu7x:2x2x1
jax: 0.10.0
libtpu: 0.0.40
codegen_flags: <defaults>
</compile_context>

<pallas_src>
import functools

import jax
import jax.numpy as jnp
from jax.experimental import pallas as pl
from jax.experimental.pallas import tpu as pltpu


def _round_up(a, b):
    return ((a + b - 1) // b) * b


def _vmem_budget_and_cap():
    """Generation-aware double-buffered working-set budget and scoped-VMEM cap."""
    try:
        phys = int(pltpu.get_tpu_info().vmem_capacity_bytes)
    except Exception:
        phys = 64 << 20  # conservative (v7x-sized) fallback if the query fails
    if phys >= (96 << 20):
        # v5e / v6e: 128 MiB physical VMEM per TC (default scoped is only
        # 16/32 MiB, so we must pass vmem_limit_bytes explicitly anyway).
        return 48 << 20, 96 << 20
    # v7x: 64 MiB physical per TC, 32 MiB default scoped; leave >8 MiB of
    # headroom below the physical ceiling for Mosaic internal scratch.
    return 24 << 20, 52 << 20


def _pick_tm(M, D, n_out, itemsize, budget):
    """Largest row tile whose *lane-padded* pipelined footprint fits `budget`."""
    d_lanes = _round_up(D, 128)       # x tile lane width (last dim)
    n_lanes = _round_up(n_out, 128)   # a [*, 3] block physically occupies 128 lanes
    resident = (_round_up(D, 8) * n_lanes + 8 * n_lanes) * itemsize  # weight + bias
    chosen = 8
    for cand in (32768, 16384, 8192, 4096, 2048, 1024, 512, 256, 128, 64, 32, 16, 8):
        need = (2 * cand * d_lanes          # x: double-buffered input tile
                + 2 * cand * n_lanes        # out: double-buffered output tile
                ) * itemsize + resident
        if need <= budget:
            chosen = cand
            break
    return chosen


def _classifier_kernel(x_ref, w_ref, b_ref, o_ref, *, cast_to_bf16):
    # x_ref: [TM, D]   w_ref: [D, N]   b_ref: [1, N]   o_ref: [TM, N]
    # TODO(synk): training-mode dropout (pltpu.prng_seed + stateful_bernoulli
    # with 1/(1-p) scaling) is omitted; eval-mode dropout is the identity.
    x = x_ref[...]
    w = w_ref[...]
    if cast_to_bf16:
        # v7x option: single-pass bf16 MXU matmul with f32 accumulation keeps
        # the MXU well under the (fast) HBM DMA time.
        x = x.astype(jnp.bfloat16)
        w = w.astype(jnp.bfloat16)
    acc = jnp.dot(x, w,
                  preferred_element_type=jnp.float32,
                  precision=jax.lax.Precision.DEFAULT)
    o_ref[...] = (acc + b_ref[...].astype(jnp.float32)).astype(o_ref.dtype)


def classifier_forward(x, weight, bias, *, tm=None, cast_to_bf16=False,
                       vmem_limit_bytes=None):
    """
    x:      [B, T, D] float32
    weight: [N, D]    float32   (PyTorch nn.Linear layout: [out, in], N = 3)
    bias:   [N]       float32
    returns [B, T, N] float32
    """
    B, T, D = x.shape
    n_out = weight.shape[0]
    M = B * T
    itemsize = jnp.dtype(x.dtype).itemsize

    budget, vmem_cap = _vmem_budget_and_cap()
    if tm is None:
        tm = _pick_tm(M, D, n_out, itemsize, budget)
    if M <= tm:
        # Single full block (block shape == full array dims is always legal,
        # even if M is not a multiple of 8).
        tm = M
    else:
        assert tm % 8 == 0, "row tile must be a multiple of 8 (f32 sublane)"

    x2d = x.reshape(M, D)
    # NOTE: for repeated calls with a static weight, pre-transpose once outside
    # this wrapper; [D, 3] is tiny so the per-call cost here is negligible.
    w = weight.T.astype(x.dtype)                  # [D, n_out]
    b2d = bias.reshape(1, n_out).astype(x.dtype)  # [1, n_out]

    # Lane-padding-aware scoped-VMEM sizing: a [tm, 3] / [D, 3] f32 block
    # physically occupies a full 128-lane stripe.
    d_lanes = _round_up(D, 128)
    n_lanes = _round_up(n_out, 128)
    need = (2 * tm * d_lanes + 2 * tm * n_lanes
            + _round_up(D, 8) * n_lanes + 8 * n_lanes) * itemsize
    if vmem_limit_bytes is None:
        vmem_limit_bytes = min(max(need + (4 << 20), 16 << 20), vmem_cap)

    # Ragged M handled by Pallas partial last blocks: no jnp.pad copy of x and
    # no output slice afterwards.  Rows are independent, so garbage in the OOB
    # region of the last input block cannot affect rows that are written back.
    grid = (pl.cdiv(M, tm),)

    # TODO(synk): on v7x, pl.Buffered(3) on the x BlockSpec can hide DMA-issue
    # jitter; enable only after checking the 3x footprint against the budget.
    kernel = functools.partial(_classifier_kernel, cast_to_bf16=cast_to_bf16)

    out2d = pl.pallas_call(
        kernel,
        out_shape=jax.ShapeDtypeStruct((M, n_out), x.dtype),
        grid_spec=pltpu.PrefetchScalarGridSpec(
            num_scalar_prefetch=0,
            grid=grid,
            in_specs=[
                pl.BlockSpec((tm, D), lambda i: (i, 0)),      # x row-tile (pipelined)
                pl.BlockSpec((D, n_out), lambda i: (0, 0)),   # weight (resident)
                pl.BlockSpec((1, n_out), lambda i: (0, 0)),   # bias (resident)
            ],
            out_specs=pl.BlockSpec((tm, n_out), lambda i: (i, 0)),
        ),
        compiler_params=pltpu.CompilerParams(
            # M axis is independent -> shard across v7x's two TensorCores.
            dimension_semantics=("parallel",),
            vmem_limit_bytes=vmem_limit_bytes,
        ),
    )(x2d, w, b2d)

    return out2d.reshape(B, T, n_out)


def classifier_ref(x, weight, bias):
    # Pure-JAX reference (identical to PyTorch eval-mode forward).
    return jnp.einsum("btd,od->bto", x, weight,
                      precision=jax.lax.Precision.HIGHEST) + bias


if __name__ == "__main__":
    key = jax.random.PRNGKey(0)

    # ---- Test 1: small shapes consistent with the module's forward ----------
    B, T, D = 2, 8, 32
    kx, kw, kb, key = jax.random.split(key, 4)
    x = jax.random.normal(kx, (B, T, D), dtype=jnp.float32)
    bound = 1.0 / (D ** 0.5)
    weight = jax.random.uniform(kw, (3, D), jnp.float32, -bound, bound)
    bias = jax.random.uniform(kb, (3,), jnp.float32, -bound, bound)

    out = jax.block_until_ready(classifier_forward(x, weight, bias))
    ref = classifier_ref(x, weight, bias)
    assert out.shape == (B, T, 3)
    assert jnp.allclose(out, ref, atol=1e-4, rtol=1e-4)

    # ---- Test 2: ragged M (B*T = 26) + large D, single full block path ------
    B2, T2, D2 = 2, 13, 1024
    kx, kw, kb, key = jax.random.split(key, 4)
    x2 = jax.random.normal(kx, (B2, T2, D2), dtype=jnp.float32)
    bound2 = 1.0 / (D2 ** 0.5)
    weight2 = jax.random.uniform(kw, (3, D2), jnp.float32, -bound2, bound2)
    bias2 = jax.random.uniform(kb, (3,), jnp.float32, -bound2, bound2)

    out2 = jax.block_until_ready(classifier_forward(x2, weight2, bias2))
    ref2 = classifier_ref(x2, weight2, bias2)
    assert out2.shape == (B2, T2, 3)
    assert jnp.allclose(out2, ref2, atol=1e-4, rtol=1e-4)

    # ---- Test 3: force a multi-step grid with a partial last block ----------
    B3, T3, D3 = 2, 13, 128     # M = 26, tm = 16 -> grid = 2, last block = 10 rows
    kx, kw, kb, key = jax.random.split(key, 4)
    x3 = jax.random.normal(kx, (B3, T3, D3), dtype=jnp.float32)
    bound3 = 1.0 / (D3 ** 0.5)
    weight3 = jax.random.uniform(kw, (3, D3), jnp.float32, -bound3, bound3)
    bias3 = jax.random.uniform(kb, (3,), jnp.float32, -bound3, bound3)

    out3 = jax.block_until_ready(classifier_forward(x3, weight3, bias3, tm=16))
    ref3 = classifier_ref(x3, weight3, bias3)
    assert out3.shape == (B3, T3, 3)
    assert jnp.allclose(out3, ref3, atol=1e-4, rtol=1e-4)

    print("KERNEL_OK")
</pallas_src>

<mosaic_0001>
module attributes {stable_mosaic.version = 11 : i64} {
  func.func @_classifier_kernel(%arg0: i32, %arg1: memref<16x32xf32, #tpu.memory_space<vmem>>, %arg2: memref<32x3xf32, #tpu.memory_space<vmem>>, %arg3: memref<1x3xf32, #tpu.memory_space<vmem>>, %arg4: memref<16x3xf32, #tpu.memory_space<vmem>>) attributes {dimension_semantics = [#tpu.dimension_semantics<parallel>], iteration_bounds = array<i64: 1>, scalar_prefetch = 0 : i64, scratch_operands = 0 : i64, tpu.core_type = #tpu.core_type<tc>, window_params = [{transform_indices = @transform_0, window_bounds = array<i64: 16, 32>}, {pipeline_mode = #tpu.pipeline_mode<synchronous>, transform_indices = @transform_1, window_bounds = array<i64: 32, 3>}, {pipeline_mode = #tpu.pipeline_mode<synchronous>, transform_indices = @transform_2, window_bounds = array<i64: 1, 3>}, {transform_indices = @transform_3, window_bounds = array<i64: 16, 3>}]} {
    %c0 = arith.constant 0 : index
    %c0_0 = arith.constant 0 : index
    %0 = vector.load %arg1[%c0, %c0_0] : memref<16x32xf32, #tpu.memory_space<vmem>>, vector<16x32xf32>
    %c0_1 = arith.constant 0 : index
    %c0_2 = arith.constant 0 : index
    %1 = vector.load %arg2[%c0_1, %c0_2] : memref<32x3xf32, #tpu.memory_space<vmem>>, vector<32x3xf32>
    %cst = arith.constant dense<0.000000e+00> : vector<16x3xf32>
    %2 = tpu.matmul %0, %1, %cst {dimension_numbers = #tpu.dot_dimension_numbers<[1], [0], [0], [1], [0, 0, 1, 1], [], []>} : vector<16x32xf32>, vector<32x3xf32>, vector<16x3xf32> -> vector<16x3xf32>
    %c0_3 = arith.constant 0 : index
    %c0_4 = arith.constant 0 : index
    %3 = vector.load %arg3[%c0_3, %c0_4] : memref<1x3xf32, #tpu.memory_space<vmem>>, vector<1x3xf32>
    %4 = vector.broadcast %3 : vector<1x3xf32> to vector<16x3xf32>
    %5 = arith.addf %2, %4 : vector<16x3xf32>
    %c0_5 = arith.constant 0 : index
    %c0_6 = arith.constant 0 : index
    %6 = vector.load %arg4[%c0_5, %c0_6] : memref<16x3xf32, #tpu.memory_space<vmem>>, vector<16x3xf32>
    tpu.vector_store %arg4[%c0_5, %c0_6], %5 {strides = array<i32>} : memref<16x3xf32, #tpu.memory_space<vmem>>, vector<16x3xf32>,
    return
  }
  func.func @transform_0(%arg0: i32) -> (i32, i32) {
    %c0_i32 = arith.constant 0 : i32
    %c0_i32_0 = arith.constant 0 : i32
    return %arg0, %c0_i32 : i32, i32
  }
  func.func @transform_1(%arg0: i32) -> (i32, i32) {
    %c0_i32 = arith.constant 0 : i32
    %c0_i32_0 = arith.constant 0 : i32
    %c0_i32_1 = arith.constant 0 : i32
    return %c0_i32, %c0_i32_0 : i32, i32
  }
  func.func @transform_2(%arg0: i32) -> (i32, i32) {
    %c0_i32 = arith.constant 0 : i32
    %c0_i32_0 = arith.constant 0 : i32
    %c0_i32_1 = arith.constant 0 : i32
    return %c0_i32, %c0_i32_0 : i32, i32
  }
  func.func @transform_3(%arg0: i32) -> (i32, i32) {
    %c0_i32 = arith.constant 0 : i32
    %c0_i32_0 = arith.constant 0 : i32
    return %arg0, %c0_i32 : i32, i32
  }
}

</mosaic_0001>

<bundles_post_ra>
// kernel: tpu_custom_call.1
= control target key start
LH: loop header
LB: loop body
LE: loop exit
PB: predicated region body
PF: predicated region fallthrough
CT: control target
= control target key end

     0   :  { %vm27_vm0 = vcmask 261120   ;;  %vm109_vm1 = vcmask 23552   ;;  %s191_s1 = inlined_call_operand.vmem [shape: f32[32,3], index: 1, kind: input, shape index: {}]   ;;  %s192_s0 = inlined_call_operand.vmem [shape: f32[16,32], index: 0, kind: input, shape index: {}]   ;;  %s193_s2 = inlined_call_operand.vmem [shape: f32[1,3], index: 2, kind: input, shape index: {}]   ;;  %s194_s3 = inlined_call_operand.vmem [shape: f32[16,3], index: 3, kind: output, shape index: {}]  }
   0x1   :  { %v16_v0 = vld [vmem:[%s191_s1] sm:$0xff]  ;;  %v17_v1 = vld [vmem:[%s191_s1 + $0x8] sm:$0xff]  ;;  %v18_v2 = vld [vmem:[%s191_s1 + $0x10] sm:$0xff] }
   0x2   :  { %v136_v3 = vpack.c.bf16 %v17_v1, %v16_v0  ;;  %v19_v4 = vld [vmem:[%s191_s1 + $0x18] sm:$0xff]  ;;  %v14_v5 = vld [vmem:[%s192_s0] sm:$0xff]  ;;  %v15_v7 = vld [vmem:[%s192_s0 + $0x8] sm:$0xff] }
   0x3   :  { %v140_v6 = vpack.c.bf16 %v19_v4, %v18_v2  ;;  %133 = vmatprep.mubr.msk.f32.mxu0 %vm27_vm0, %v14_v5  ;;  %v116_v8 = vld [vmem:[%s193_s2] ss:$0 sm:$0xff] }
   0x4   :  { %137 = vmatprep.subr.bf16.mxu0 %v136_v3 }
   0x5   :  { %139 = vmatpush3.bf16.msra.mxu0 %v136_v3 }
   0x6   :  { %141 = vmatprep.subr.bf16.mxu0 %v140_v6 }
   0x9   :  { %143 = vmatpush3.bf16.msra.mxu0 %v140_v6 }
   0xc   :  { %134 = vmatmul.mubr.msk.f32.vlgmr.msra.gmra.mrb[0].mxu0 %vm27_vm0, %v15_v7 }
  0xdf   :  { %v135_v9 = vpop.f32.mrb[0].mxu0 }
  0xe0   :  { %v106_v10 = vadd.f32 %v135_v9, %v116_v8  ;;  %v100_v11 = vpop.f32.mrb[1].mxu0 }
  0xe1   :  { %v101_v12 = vadd.f32 %v116_v8, %v100_v11 }
  0xe2   :  { %111 = vst.msk [vmem:[%s194_s3 + $0x8] sm:$0xff] %vm109_vm1, %v106_v10 }
  0xe3   :  { %110 = vst.msk [vmem:[%s194_s3] sm:$0xff] %vm109_vm1, %v101_v12 }

</bundles_post_ra>
